<compile_context>
chip_gen: v6e
topology: v6e:2x2x1
jax: 0.10.0
libtpu: 0.0.40
codegen_flags: <defaults>
</compile_context>

<pallas_src>
import functools

import jax
import jax.numpy as jnp
from jax import lax
from jax.experimental import pallas as pl
from jax.experimental.pallas import tpu as pltpu


def _round_up(x, m):
    return (x + m - 1) // m * m


def _choose_tile(n, tile_cap=12288):
    """Row-tile size: DMA-bound (not step-overhead-bound) steps, an even grid
    of >= 2 for megacore, padding bounded by 512 rows per step."""
    n_al = _round_up(max(n, 1), 16)            # sublane granularity (bf16-safe)
    if n_al < 2048:
        return n_al                            # tiny problem: one (partial) step
    steps = max(2, -(-n_al // tile_cap))
    steps += steps % 2                         # even split across 2 TensorCores
    return _round_up(-(-n_al // steps), 512)


def _reward_mlp_kernel(x_ref, w1_ref, b1_ref, w2_ref, b2_ref, w3_ref, b3_ref,
                       o_ref, *, hidden_dtype, include_tanh, clamp_max):
    # x_ref : (TILE, D) native row-major rows, pipelined from HBM
    # w1_ref: (H, D),  b1_ref: (H, 1)
    # w2_ref: (H, H),  b2_ref: (H, 1)
    # w3_ref: (1, H),  b3_ref: (1, 1)
    # o_ref : (1, TILE) lane-dense output tile
    x = x_ref[...]
    w1 = w1_ref[...].astype(x.dtype)
    # Fold the row->lane transpose into the matmul: contract D on both sides.
    z1 = lax.dot_general(w1, x, (((1,), (1,)), ((), ())),
                         preferred_element_type=jnp.float32) + b1_ref[...]
    h1 = jnp.tanh(z1.astype(hidden_dtype))                     # (H, TILE)
    z2 = jnp.dot(w2_ref[...].astype(hidden_dtype), h1,
                 preferred_element_type=jnp.float32) + b2_ref[...]
    h2 = jnp.tanh(z2.astype(hidden_dtype))                     # (H, TILE)
    out = jnp.dot(w3_ref[...].astype(hidden_dtype), h2,
                  preferred_element_type=jnp.float32) + b3_ref[...]   # (1, TILE)
    if include_tanh:
        out = jnp.tanh(out)
    if clamp_max is not None:
        out = jnp.clip(out, -clamp_max, clamp_max)
    o_ref[...] = out


def init_neural_reward_params(key, obs_dim, hidden_dim):
    """Deterministic PyTorch-nn.Linear-style init (uniform +/- 1/sqrt(fan_in))."""
    ks = jax.random.split(key, 6)

    def _linear(kw, kb, fan_in, fan_out):
        bound = 1.0 / jnp.sqrt(jnp.float32(fan_in))
        w = jax.random.uniform(kw, (fan_in, fan_out), jnp.float32, -bound, bound)
        b = jax.random.uniform(kb, (1, fan_out), jnp.float32, -bound, bound)
        return w, b

    w1, b1 = _linear(ks[0], ks[1], obs_dim, hidden_dim)
    w2, b2 = _linear(ks[2], ks[3], hidden_dim, hidden_dim)
    w3, b3 = _linear(ks[4], ks[5], hidden_dim, 1)
    return dict(w1=w1, b1=b1, w2=w2, b2=b2, w3=w3, b3=b3)


def neural_reward_forward(params, next_obs, *, include_tanh=False,
                          clamp_max=None, cost_take_dim=-1,
                          hidden_dtype=jnp.float32, tile_cap=12288):
    """Pallas-backed forward of NeuralReward (reward_type=NEXT_STATE)."""
    # TODO(synk): reward_type=ACTION / CUR_NEXT_STATE would simply concatenate
    # [cur_obs, actions] / [cur_obs, next_obs] on the last dim here.
    if cost_take_dim != -1:
        next_obs = next_obs[:, :, :cost_take_dim]   # glue, stays in plain JAX

    t, b, d = next_obs.shape
    n = t * b
    x = next_obs.reshape(n, d)        # free view; streams in its native dtype

    tile = _choose_tile(n, tile_cap)
    grid = -(-n // tile)              # cdiv; last x block may read past N
    n_out = grid * tile               # only the tiny (1, N) output is padded

    hdim = params["w1"].shape[1]
    w1t = params["w1"].T                      # (H, D)   tiny XLA transposes
    b1t = params["b1"].reshape(1, hdim).T     # (H, 1)
    w2t = params["w2"].T                      # (H, H)
    b2t = params["b2"].reshape(1, hdim).T     # (H, 1)
    w3t = params["w3"].reshape(hdim, 1).T     # (1, H)
    b3 = params["b3"].reshape(1, 1)           # (1, 1)

    kernel = functools.partial(
        _reward_mlp_kernel, hidden_dtype=hidden_dtype,
        include_tanh=include_tanh, clamp_max=clamp_max)

    const = lambda i: (0, 0)   # weights/biases: VMEM-resident across steps
    out = pl.pallas_call(
        kernel,
        out_shape=jax.ShapeDtypeStruct((1, n_out), jnp.float32),
        grid=(grid,),
        in_specs=[
            pl.BlockSpec((tile, d), lambda i: (i, 0)),     # x rows, pipelined
            pl.BlockSpec((hdim, d), const),
            pl.BlockSpec((hdim, 1), const),
            pl.BlockSpec((hdim, hdim), const),
            pl.BlockSpec((hdim, 1), const),
            pl.BlockSpec((1, hdim), const),
            pl.BlockSpec((1, 1), const),
        ],
        out_specs=pl.BlockSpec((1, tile), lambda i: (0, i)),
        compiler_params=pltpu.CompilerParams(
            dimension_semantics=("parallel",),
            vmem_limit_bytes=32 * 1024 * 1024),
    )(x, w1t, b1t, w2t, b2t, w3t, b3)

    # Rows >= N in the last block are garbage (OOB reads) and are sliced off
    # here before the (T, B, 1) reshape.
    return out[0, :n].reshape(t, b, 1)


def _reference_forward(params, next_obs, include_tanh=False, clamp_max=None):
    t, b, d = next_obs.shape
    x = next_obs.reshape(t * b, d).astype(jnp.float32)
    h = jnp.tanh(x @ params["w1"] + params["b1"])
    h = jnp.tanh(h @ params["w2"] + params["b2"])
    out = h @ params["w3"] + params["b3"]
    if include_tanh:
        out = jnp.tanh(out)
    if clamp_max is not None:
        out = jnp.clip(out, -clamp_max, clamp_max)
    return out.reshape(t, b, 1)


if __name__ == "__main__":
    # obs_shape=(16,), reward_hidden_dim=32, n_hidden_layers=2.
    OBS_DIM, HIDDEN_DIM = 16, 32

    key = jax.random.PRNGKey(0)
    k_params, k_obs, k_obs2, k_obs3 = jax.random.split(key, 4)
    params = init_neural_reward_params(k_params, OBS_DIM, HIDDEN_DIM)

    # 1) Tiny single-step grid, default config.
    T, B = 8, 2
    next_obs = jax.random.normal(k_obs, (T, B, OBS_DIM), dtype=jnp.float32)
    out = jax.block_until_ready(neural_reward_forward(params, next_obs))
    ref = _reference_forward(params, next_obs)
    assert out.shape == (T, B, 1), out.shape
    assert jnp.allclose(out, ref, atol=5e-5, rtol=5e-5), "mismatch (tiny)"

    # 2) Non-multiple row count -> 2-step grid, partial last block, tanh+clamp.
    T2, B2 = 64, 33                         # N = 2112 -> tile 1536, grid 2
    next_obs2 = jax.random.normal(k_obs2, (T2, B2, OBS_DIM), dtype=jnp.float32)
    out2 = jax.block_until_ready(
        neural_reward_forward(params, next_obs2, include_tanh=True,
                              clamp_max=0.5))
    ref2 = _reference_forward(params, next_obs2, include_tanh=True,
                              clamp_max=0.5)
    assert out2.shape == (T2, B2, 1), out2.shape
    assert jnp.allclose(out2, ref2, atol=5e-5, rtol=5e-5), "mismatch (tiled)"

    # 3) Larger even multi-step grid exercising the big-tile path.
    T3, B3 = 64, 256                        # N = 16384 -> tile 8192, grid 2
    next_obs3 = jax.random.normal(k_obs3, (T3, B3, OBS_DIM), dtype=jnp.float32)
    out3 = jax.block_until_ready(neural_reward_forward(params, next_obs3))
    ref3 = _reference_forward(params, next_obs3)
    assert out3.shape == (T3, B3, 1), out3.shape
    assert jnp.allclose(out3, ref3, atol=5e-5, rtol=5e-5), "mismatch (big tile)"

    # 4) bf16 input stream + bf16 hidden/tanh path (v6e/v7x EUP lever).
    obs_bf16 = next_obs2.astype(jnp.bfloat16)
    out_bf = jax.block_until_ready(
        neural_reward_forward(params, obs_bf16, include_tanh=True,
                              clamp_max=0.5, hidden_dtype=jnp.bfloat16))
    ref_bf = _reference_forward(params, obs_bf16, include_tanh=True,
                                clamp_max=0.5)
    assert out_bf.shape == (T2, B2, 1), out_bf.shape
    assert jnp.allclose(out_bf, ref_bf, atol=3e-2, rtol=3e-2), "mismatch (bf16)"

    print("KERNEL_OK")
</pallas_src>

<mosaic_0001>
module attributes {stable_mosaic.version = 11 : i64} {
  func.func @_reward_mlp_kernel(%arg0: i32, %arg1: memref<16x16xf32, #tpu.memory_space<vmem>>, %arg2: memref<32x16xf32, #tpu.memory_space<vmem>>, %arg3: memref<32x1xf32, #tpu.memory_space<vmem>>, %arg4: memref<32x32xf32, #tpu.memory_space<vmem>>, %arg5: memref<32x1xf32, #tpu.memory_space<vmem>>, %arg6: memref<1x32xf32, #tpu.memory_space<vmem>>, %arg7: memref<1x1xf32, #tpu.memory_space<vmem>>, %arg8: memref<1x16xf32, #tpu.memory_space<vmem>>) attributes {dimension_semantics = [#tpu.dimension_semantics<parallel>], iteration_bounds = array<i64: 1>, scalar_prefetch = 0 : i64, scratch_operands = 0 : i64, tpu.core_type = #tpu.core_type<tc>, window_params = [{transform_indices = @transform_0, window_bounds = array<i64: 16, 16>}, {pipeline_mode = #tpu.pipeline_mode<synchronous>, transform_indices = @transform_1, window_bounds = array<i64: 32, 16>}, {pipeline_mode = #tpu.pipeline_mode<synchronous>, transform_indices = @transform_2, window_bounds = array<i64: 32, 1>}, {pipeline_mode = #tpu.pipeline_mode<synchronous>, transform_indices = @transform_3, window_bounds = array<i64: 32, 32>}, {pipeline_mode = #tpu.pipeline_mode<synchronous>, transform_indices = @transform_4, window_bounds = array<i64: 32, 1>}, {pipeline_mode = #tpu.pipeline_mode<synchronous>, transform_indices = @transform_5, window_bounds = array<i64: 1, 32>}, {pipeline_mode = #tpu.pipeline_mode<synchronous>, transform_indices = @transform_6, window_bounds = array<i64: 1, 1>}, {transform_indices = @transform_7, window_bounds = array<i64: 1, 16>}]} {
    %c0 = arith.constant 0 : index
    %c0_0 = arith.constant 0 : index
    %0 = vector.load %arg1[%c0, %c0_0] : memref<16x16xf32, #tpu.memory_space<vmem>>, vector<16x16xf32>
    %c0_1 = arith.constant 0 : index
    %c0_2 = arith.constant 0 : index
    %1 = vector.load %arg2[%c0_1, %c0_2] : memref<32x16xf32, #tpu.memory_space<vmem>>, vector<32x16xf32>
    %cst = arith.constant dense<0.000000e+00> : vector<32x16xf32>
    %2 = tpu.matmul %1, %0, %cst {dimension_numbers = #tpu.dot_dimension_numbers<[1], [1], [0], [0], [0, 0, 1, 0], [], []>} : vector<32x16xf32>, vector<16x16xf32>, vector<32x16xf32> -> vector<32x16xf32>
    %c0_3 = arith.constant 0 : index
    %c0_4 = arith.constant 0 : index
    %3 = vector.load %arg3[%c0_3, %c0_4] : memref<32x1xf32, #tpu.memory_space<vmem>>, vector<32x1xf32>
    %4 = vector.broadcast %3 : vector<32x1xf32> to vector<32x16xf32>
    %5 = arith.addf %2, %4 : vector<32x16xf32>
    %6 = math.tanh %5 : vector<32x16xf32>
    %c0_5 = arith.constant 0 : index
    %c0_6 = arith.constant 0 : index
    %7 = vector.load %arg4[%c0_5, %c0_6] : memref<32x32xf32, #tpu.memory_space<vmem>>, vector<32x32xf32>
    %cst_7 = arith.constant dense<0.000000e+00> : vector<32x16xf32>
    %8 = tpu.matmul %7, %6, %cst_7 {dimension_numbers = #tpu.dot_dimension_numbers<[1], [0], [0], [1], [0, 0, 1, 1], [], []>} : vector<32x32xf32>, vector<32x16xf32>, vector<32x16xf32> -> vector<32x16xf32>
    %c0_8 = arith.constant 0 : index
    %c0_9 = arith.constant 0 : index
    %9 = vector.load %arg5[%c0_8, %c0_9] : memref<32x1xf32, #tpu.memory_space<vmem>>, vector<32x1xf32>
    %10 = vector.broadcast %9 : vector<32x1xf32> to vector<32x16xf32>
    %11 = arith.addf %8, %10 : vector<32x16xf32>
    %12 = math.tanh %11 : vector<32x16xf32>
    %c0_10 = arith.constant 0 : index
    %c0_11 = arith.constant 0 : index
    %13 = vector.load %arg6[%c0_10, %c0_11] : memref<1x32xf32, #tpu.memory_space<vmem>>, vector<1x32xf32>
    %cst_12 = arith.constant dense<0.000000e+00> : vector<1x16xf32>
    %14 = tpu.matmul %13, %12, %cst_12 {dimension_numbers = #tpu.dot_dimension_numbers<[1], [0], [0], [1], [0, 0, 1, 1], [], []>} : vector<1x32xf32>, vector<32x16xf32>, vector<1x16xf32> -> vector<1x16xf32>
    %c0_13 = arith.constant 0 : index
    %c0_14 = arith.constant 0 : index
    %15 = vector.load %arg7[%c0_13, %c0_14] : memref<1x1xf32, #tpu.memory_space<vmem>>, vector<1x1xf32>
    %16 = vector.broadcast %15 : vector<1x1xf32> to vector<1x16xf32>
    %17 = arith.addf %14, %16 : vector<1x16xf32>
    %c0_15 = arith.constant 0 : index
    %c0_16 = arith.constant 0 : index
    %18 = vector.load %arg8[%c0_15, %c0_16] : memref<1x16xf32, #tpu.memory_space<vmem>>, vector<1x16xf32>
    tpu.vector_store %arg8[%c0_15, %c0_16], %17 {strides = array<i32>} : memref<1x16xf32, #tpu.memory_space<vmem>>, vector<1x16xf32>,
    return
  }
  func.func @transform_0(%arg0: i32) -> (i32, i32) {
    %c0_i32 = arith.constant 0 : i32
    %c0_i32_0 = arith.constant 0 : i32
    return %arg0, %c0_i32 : i32, i32
  }
  func.func @transform_1(%arg0: i32) -> (i32, i32) {
    %c0_i32 = arith.constant 0 : i32
    %c0_i32_0 = arith.constant 0 : i32
    %c0_i32_1 = arith.constant 0 : i32
    return %c0_i32, %c0_i32_0 : i32, i32
  }
  func.func @transform_2(%arg0: i32) -> (i32, i32) {
    %c0_i32 = arith.constant 0 : i32
    %c0_i32_0 = arith.constant 0 : i32
    %c0_i32_1 = arith.constant 0 : i32
    return %c0_i32, %c0_i32_0 : i32, i32
  }
  func.func @transform_3(%arg0: i32) -> (i32, i32) {
    %c0_i32 = arith.constant 0 : i32
    %c0_i32_0 = arith.constant 0 : i32
    %c0_i32_1 = arith.constant 0 : i32
    return %c0_i32, %c0_i32_0 : i32, i32
  }
  func.func @transform_4(%arg0: i32) -> (i32, i32) {
    %c0_i32 = arith.constant 0 : i32
    %c0_i32_0 = arith.constant 0 : i32
    %c0_i32_1 = arith.constant 0 : i32
    return %c0_i32, %c0_i32_0 : i32, i32
  }
  func.func @transform_5(%arg0: i32) -> (i32, i32) {
    %c0_i32 = arith.constant 0 : i32
    %c0_i32_0 = arith.constant 0 : i32
    %c0_i32_1 = arith.constant 0 : i32
    return %c0_i32, %c0_i32_0 : i32, i32
  }
  func.func @transform_6(%arg0: i32) -> (i32, i32) {
    %c0_i32 = arith.constant 0 : i32
    %c0_i32_0 = arith.constant 0 : i32
    %c0_i32_1 = arith.constant 0 : i32
    return %c0_i32, %c0_i32_0 : i32, i32
  }
  func.func @transform_7(%arg0: i32) -> (i32, i32) {
    %c0_i32 = arith.constant 0 : i32
    %c0_i32_0 = arith.constant 0 : i32
    return %c0_i32, %arg0 : i32, i32
  }
}

</mosaic_0001>

<bundles_post_ra>
// kernel: tpu_custom_call.1
= control target key start
LH: loop header
LB: loop body
LE: loop exit
PB: predicated region body
PF: predicated region fallthrough
CT: control target
= control target key end

     0   :  { %s626_s0 = inlined_call_operand.vmem [shape: f32[16,16], index: 0, kind: input, shape index: {}]   ;;  %s627_s1 = inlined_call_operand.vmem [shape: f32[32,16], index: 1, kind: input, shape index: {}]   ;;  %s628_s2 = inlined_call_operand.vmem [shape: f32[32,1], index: 2, kind: input, shape index: {}]   ;;  %s629_s3 = inlined_call_operand.vmem [shape: f32[32,32], index: 3, kind: input, shape index: {}]   ;;  %s630_s4 = inlined_call_operand.vmem [shape: f32[32,1], index: 4, kind: input, shape index: {}]   ;;  %s631_s5 = inlined_call_operand.vmem [shape: f32[1,32], index: 5, kind: input, shape index: {}]   ;;  %s632_s6 = inlined_call_operand.<no memory space> [shape: f32[1,1], index: 6, kind: input, shape index: {}]   ;;  %s633_s7 = inlined_call_operand.hbm [shape: f32[1,16], index: 7, kind: output, shape index: {}]  }
   0x1   :  { %v12_v0 = vstv %s632_s6 }
   0x2   :  { %13 = vst [vmem:[#allocation2] sm:$0x1] %v12_v0 }
   0x3   :  { %v30_v1 = vld [vmem:[%s626_s0 + $0x8] sm:$0xff]  ;;  %vm59_vm0 = vcmask 130048   ;;  %v29_v2 = vld [vmem:[%s626_s0] sm:$0xff]  ;;  %v506_v4 = vmov 0   ;;  %v38_v5 = vld [vmem:[%s628_s2 + $0x18] sm:$0xff] }
   0x4   :  { %v31_v3 = vld [vmem:[%s627_s1] sm:$0xff]  ;;  %427 = vmatprep.subr.msk.mxu0 %vm59_vm0, %v30_v1  ;;  %466 = vset.pattern.permute.xlu0 %v506_v4  ;;  %v36_v6 = vld [vmem:[%s628_s2 + $0x8] sm:$0xff]  ;;  %v37_v7 = vld [vmem:[%s628_s2 + $0x10] sm:$0xff] }
   0x5   :  { %431 = vmatprep.mubr.msk.f32.mxu0 %vm59_vm0, %v31_v3  ;;  %428 = vmatpush3.xpose.msk.msra.mxu0 %vm59_vm0, %v30_v1 }
   0x6   :  { %429 = vmatprep.subr.msk.mxu0 %vm59_vm0, %v29_v2  ;;  %56 = vperm.xlu0 %466, %v38_v5  }
   0x7   :  { %467 = vset.pattern.permute.xlu1 %v506_v4 }
   0x8   :  { %46 = vperm.xlu1 %467, %v36_v6  }
   0x9   :  { %14 = vsyncpa [#allocation4], 0  ;;  %430 = vmatpush3.xpose.msk.msra.mxu0 %vm59_vm0, %v29_v2  ;;  %v32_v8 = vld [vmem:[%s627_s1 + $0x8] sm:$0xff]  ;;  %v35_v9 = vld [vmem:[%s628_s2] sm:$0xff]  ;;  %vm195_vm1 = vcmask 261120   ;;  %v507_v37 = vmov 0.0   ;;  %v304_v55 = vlaneseq }
   0xa   :  { %v33_v10 = vld [vmem:[%s627_s1 + $0x10] sm:$0xff]  ;;  %51 = vperm.xlu0 %466, %v37_v7   ;;  %v174_v11 = vld [vmem:[%s630_s4 + $0x18] sm:$0xff]  ;;  %v172_v14 = vld [vmem:[%s630_s4 + $0x8] sm:$0xff]  ;;  %451 = vmatprep.subr.mxu0 %v507_v37  ;;  %vm508_vm2 = vmmov 0   ;;  %s509_s10 = smov [#allocation3]   ;;  %vm381_vm3 = vcmask 122880  }
   0xb   :  { %v34_v12 = vld [vmem:[%s627_s1 + $0x18] sm:$0xff]  ;;  %v173_v13 = vld [vmem:[%s630_s4 + $0x10] sm:$0xff]  ;;  %v171_v15 = vld [vmem:[%s630_s4] sm:$0xff]  ;;  %v305_v56 = vshrl.u32 %v304_v55, 7  ;;  %s389_s11 = sshll.u32 %s509_s10, 4  ;;  %s390_s11 = int_to_ptr.vmem [resolvable:$true] %s389_s11 }
   0xc   :  { %432 = vmatmul.mubr.msk.f32.vlgmr.msra.gmra.mxu0 %vm59_vm0, %v32_v8  ;;  %41 = vperm.xlu1 %467, %v35_v9   ;;  %v298_v16 = vld [vmem:[#allocation2] sm:$0x1]  ;;  %v168_v34 = vld [vmem:[%s629_s3 + $0x8] sm:$0xff]  ;;  %v169_v35 = vld [vmem:[%s629_s3 + $0x10] sm:$0xff]  ;;  %s484_s12 = scalar_lea.vmem %s390_s11, 16  ;;  %p489_p1 = scmp.lt.s32.totalorder %s390_s11, %s390_s11 }
   0xd   :  { %434 = vmatprep.mubr.msk.f32.mxu0 %vm59_vm0, %v33_v10  ;;  %v167_v17 = vld [vmem:[%s629_s3] sm:$0xff]  ;;  %v170_v36 = vld [vmem:[%s629_s3 + $0x18] sm:$0xff]  ;;  %v306_v57 = vsub.s32 0, %v305_v56  ;;  %p485_p0 = scmp.ne.s32.totalorder %s390_s11, %s484_s12 }
   0xe   :  { %192 = vperm.xlu0 %466, %v174_v11   ;;  %445 = vmatprep.mubr.msk.f32.mxu1 %vm195_vm1, %v167_v17  ;;  %v297_v53 = vld [vmem:[%s631_s5] sm:$0x1]  ;;  %s488_s5 = scalar_lea.vmem %s390_s11, 32 }
   0xf   :  { %p490_p2 = scmp.lt.s32.totalorder %s488_s5, %s484_s12 }
  0x10   :  { %435 = vmatmul.mubr.msk.f32.gmra.mxu0 %vm59_vm0, %v34_v12  ;;  %187 = vperm.xlu1 %467, %v173_v13  }
  0x11   :  { %459 = vmatprep.mubr.msk.f32.mxu0 %vm508_vm2, %v507_v37  ;;  %p491_p3 = por %p490_p2, %p489_p1 }
  0x12   :  { %182 = vperm.xlu0 %466, %v172_v14  }
  0x13   :  { %p492_p4 = pnand %p491_p3, %p485_p0 }
  0x14   :  { %177 = vperm.xlu1 %467, %v171_v15  }
  0x16   :  { %301 = vperm.xlu0 %466, %v298_v16  }
  0x81   :  { %v57_v18 = vpop.permute.xlu0 %56 }
  0x83   :  { %v47_v20 = vpop.permute.xlu1 %46 }
  0x85   :  { %v52_v24 = vpop.permute.xlu0 %51 }
  0x87   :  { %v42_v28 = vpop.permute.xlu1 %41 }
  0x89   :  { %v193_v38 = vpop.permute.xlu0 %192 }
  0x8b   :  { %v188_v40 = vpop.permute.xlu1 %187 }
  0x8d   :  { %v183_v44 = vpop.permute.xlu0 %182 }
  0x8f   :  { %v178_v48 = vpop.permute.xlu1 %177 }
  0x91   :  { %v302_v58 = vpop.permute.xlu0 %301 }
  0x92   :  { %v307_v59 = vrot.slane %v302_v58, %v306_v57 }
  0xcc   :  { %v433_v19 = vpop.f32.mrf.mxu0 }
  0xcd   :  { %v150_v26 = vadd.f32 %v433_v19, %v47_v20 }
  0xce   :  { %v144_v21 = vpop.f32.mrf.mxu0 }
  0xcf   :  { %v145_v29 = vadd.f32 %v144_v21, %v42_v28 }
  0xd0   :  { %v436_v22 = vpop.f32.mrf.mxu0 }
  0xd1   :  { %v160_v23 = vadd.f32 %v436_v22, %v57_v18 }
  0xd2   :  { %v154_v25 = vpop.f32.mrf.mxu0 }
  0xd3   :  { %468 = vtanh.f32 %v160_v23  ;;  %v155_v27 = vadd.f32 %v154_v25, %v52_v24 }
  0xd5   :  { %470 = vtanh.f32 %v155_v27 }
  0xd6   :  { %472 = vtanh.f32 %v150_v26 }
  0xd7   :  { %474 = vtanh.f32 %v145_v29 }
  0xe0   :  { %v469_v30 = vpop.eup %468 }
  0xe1   :  { %437 = vmatprep.subr.mxu1 %v469_v30 }
  0xe2   :  { %v471_v31 = vpop.eup %470  ;;  %438 = vmatpush3.msra.mxu1 %v469_v30 }
  0xe3   :  { %439 = vmatprep.subr.mxu1 %v471_v31  ;;  %v473_v32 = vpop.eup %472 }
  0xe4   :  { %440 = vmatpush3.msra.mxu1 %v471_v31  ;;  %v475_v33 = vpop.eup %474 }
  0xe5   :  { %441 = vmatprep.subr.mxu1 %v473_v32 }
  0xe6   :  { %442 = vmatpush3.msra.mxu1 %v473_v32 }
  0xe7   :  { %443 = vmatprep.subr.mxu1 %v475_v33 }
  0xe8   :  { %444 = vmatpush3.msra.mxu1 %v475_v33 }
  0xe9   :  { %446 = vmatmul.mubr.msk.f32.vlgmr.msra.gmra.mxu1 %vm195_vm1, %v168_v34 }
  0xea   :  { %448 = vmatprep.mubr.msk.f32.mxu1 %vm195_vm1, %v169_v35 }
  0xed   :  { %449 = vmatmul.mubr.msk.f32.gmra.mxu1 %vm195_vm1, %v170_v36 }
 0x1a9   :  { %v447_v39 = vpop.f32.mrf.mxu1 }
 0x1aa   :  { %v280_v46 = vadd.f32 %v447_v39, %v183_v44 }
 0x1ab   :  { %v274_v41 = vpop.f32.mrf.mxu1 }
 0x1ac   :  { %v275_v49 = vadd.f32 %v274_v41, %v178_v48 }
 0x1ad   :  { %v450_v42 = vpop.f32.mrf.mxu1 }
 0x1ae   :  { %v290_v43 = vadd.f32 %v450_v42, %v193_v38 }
 0x1af   :  { %v284_v45 = vpop.f32.mrf.mxu1 }
 0x1b0   :  { %476 = vtanh.f32 %v290_v43  ;;  %v285_v47 = vadd.f32 %v284_v45, %v188_v40 }
 0x1b2   :  { %478 = vtanh.f32 %v285_v47 }
 0x1b3   :  { %480 = vtanh.f32 %v280_v46 }
 0x1b4   :  { %482 = vtanh.f32 %v275_v49 }
 0x1bd   :  { %v477_v50 = vpop.eup %476 }
 0x1be   :  { %452 = vmatpush3.msra.mxu0 %v477_v50 }
 0x1bf   :  { %v479_v51 = vpop.eup %478  ;;  %453 = vmatprep.subr.mxu0 %v507_v37 }
 0x1c0   :  { %454 = vmatpush3.msra.mxu0 %v479_v51  ;;  %v481_v52 = vpop.eup %480 }
 0x1c1   :  { %455 = vmatprep.subr.mxu0 %v507_v37  ;;  %v483_v54 = vpop.eup %482 }
 0x1c2   :  { %456 = vmatpush3.msra.mxu0 %v481_v52 }
 0x1c3   :  { %457 = vmatprep.subr.mxu0 %v507_v37 }
 0x1c4   :  { %458 = vmatpush3.msra.mxu0 %v483_v54 }
 0x1c5   :  { %460 = vmatmul.mubr.msk.f32.vlgmr.msra.gmra.mxu0 %vm195_vm1, %v297_v53 }
 0x285   :  { %v377_v60 = vpop.f32.mrf.mxu0 }
 0x286   :  { %v378_v61 = vadd.f32 %v377_v60, %v307_v59 }
 0x287   :  { %v461_v62 = vpop.f32.mrf.mxu0 }
 0x288   :  { %382 = vst.msk [vmem:[#allocation3] sm:$0x1] %vm381_vm3, %v378_v61 }
 0x289   :  { %495 = shalt.err (!%p492_p4)
}
 0x28a   :  { %392 = dma.vmem_to_hbm [thread:$0]  %s390_s11, 16, %s633_s7, [#allocation4]  }
 0x28b   :  { %504 = dma.done.wait [#allocation4], 16  }
 0x28c   :  { %505 = vsyncadd [#allocation4], 4294967280 }
 0x28d   :  { %396 = vsyncpa [#allocation4], 1 }

</bundles_post_ra>
